<compile_context>
chip_gen: v6e
topology: v6e:2x2x1
jax: 0.10.0
libtpu: 0.0.40
codegen_flags: <defaults>
</compile_context>

<pallas_src>
import jax
import jax.numpy as jnp
from jax.experimental import pallas as pl
from jax.experimental.pallas import tpu as pltpu


# ---------------------------------------------------------------------------
# Kernel
# ---------------------------------------------------------------------------
def _linear(h, w_ref, b_ref, relu):
    w = w_ref[...]
    # Match activation dtype to the weight dtype (bf16 or f32) so the MXU sees
    # matched operands; accumulate in f32 regardless.
    y = jnp.dot(h.astype(w.dtype), w, preferred_element_type=jnp.float32)
    y = y + b_ref[...]                        # bias kept f32 (f32 VPU add)
    if relu:
        y = jnp.maximum(y, 0.0)
    return y


def controller_kernel(x_ref, w1, b1, w2, b2, w3, b3, out_ref):
    h = x_ref[...]                            # (tile, input_dim)
    h = _linear(h, w1, b1, relu=True)         # (tile, 64)
    h = _linear(h, w2, b2, relu=True)         # (tile, 64)
    y = _linear(h, w3, b3, relu=False)        # (tile, 2)
    out_ref[...] = y.astype(out_ref.dtype)


# ---------------------------------------------------------------------------
# Wrapper
# ---------------------------------------------------------------------------
def _round_up(n, m):
    return ((n + m - 1) // m) * m


def _choose_tile(batch, tile_b):
    tile_b = max(8, _round_up(tile_b, 8))
    tile = min(tile_b, _round_up(batch, 8))
    # Keep >= 2 grid steps for larger batches so the "parallel" grid axis can
    # shard across both TensorCores on v7x instead of collapsing to 1 step.
    if batch >= 256:
        tile = min(tile, _round_up(pl.cdiv(batch, 2), 8))
    return max(8, tile)


def controller_forward(x, params, *, tile_b=512, use_bf16=True):
    """x: [B, input_dim] float32. params: [(W1,b1),(W2,b2),(W3,b3)], W: [in,out]."""
    B, in_dim = x.shape
    out_dim = params[-1][0].shape[1]

    tile = _choose_tile(B, tile_b)
    B_pad = _round_up(B, tile)

    compute_dtype = jnp.bfloat16 if use_bf16 else jnp.float32
    xin = x.astype(compute_dtype)
    if B_pad != B:
        xin = jnp.pad(xin, ((0, B_pad - B), (0, 0)))   # zero rows, sliced off later

    args = [xin]
    in_specs = [pl.BlockSpec((tile, in_dim), lambda i: (i, 0))]
    for (w, b) in params:
        w_c = w.astype(compute_dtype)
        b_c = b.reshape(1, -1).astype(jnp.float32)
        args.extend([w_c, b_c])
        # Constant block index => fetched once, re-used across all grid steps.
        in_specs.append(pl.BlockSpec(w_c.shape, lambda i: (0, 0)))
        in_specs.append(pl.BlockSpec(b_c.shape, lambda i: (0, 0)))

    out = pl.pallas_call(
        controller_kernel,
        out_shape=jax.ShapeDtypeStruct((B_pad, out_dim), jnp.float32),
        grid_spec=pltpu.PrefetchScalarGridSpec(
            num_scalar_prefetch=0,
            grid=(B_pad // tile,),
            in_specs=in_specs,
            out_specs=pl.BlockSpec((tile, out_dim), lambda i: (i, 0)),
        ),
        compiler_params=pltpu.CompilerParams(
            dimension_semantics=("parallel",),
            vmem_limit_bytes=32 * 1024 * 1024,
        ),
    )(*args)

    return out[:B] if B_pad != B else out


# ---------------------------------------------------------------------------
# Params / reference
# ---------------------------------------------------------------------------
def init_linear(key, fan_in, fan_out):
    """PyTorch-style uniform(+-1/sqrt(fan_in)) init, deterministic."""
    kw, kb = jax.random.split(key)
    bound = 1.0 / jnp.sqrt(jnp.float32(fan_in))
    w = jax.random.uniform(kw, (fan_in, fan_out), jnp.float32, -bound, bound)
    b = jax.random.uniform(kb, (fan_out,), jnp.float32, -bound, bound)
    return w, b


def make_params(input_dim, key):
    dims = [(input_dim, 64), (64, 64), (64, 2)]
    keys = jax.random.split(key, len(dims))
    return [init_linear(k, fi, fo) for k, (fi, fo) in zip(keys, dims)]


def controller_reference(x, params):
    """Pure-JAX reference matching the PyTorch forward (highest precision)."""
    h = x
    n = len(params)
    for i, (w, b) in enumerate(params):
        h = jnp.dot(h, w, precision=jax.lax.Precision.HIGHEST) + b
        if i < n - 1:
            h = jnp.maximum(h, 0.0)
    return h


# ---------------------------------------------------------------------------
# Self-test
# ---------------------------------------------------------------------------
if __name__ == "__main__":
    input_dim = 10

    key = jax.random.PRNGKey(0)
    kx, kp, kx2 = jax.random.split(key, 3)
    params = make_params(input_dim, kp)

    # --- f32 path, small batch (exercises batch padding 20 -> 24, grid=1) ---
    batch = 20
    x = jax.random.normal(kx, (batch, input_dim), jnp.float32)
    y32 = controller_forward(x, params, use_bf16=False)
    jax.block_until_ready(y32)
    ref = controller_reference(x, params)
    assert y32.shape == (batch, 2)
    assert jnp.allclose(y32, ref, atol=5e-3, rtol=5e-3)

    # --- default bf16-operand path, multi-step grid (200 -> 256, grid=4) ---
    batch2 = 200
    x2 = jax.random.normal(kx2, (batch2, input_dim), jnp.float32)
    y16 = controller_forward(x2, params, tile_b=64)
    jax.block_until_ready(y16)
    ref2 = controller_reference(x2, params)
    assert y16.shape == (batch2, 2)
    assert jnp.allclose(y16, ref2, atol=5e-2, rtol=5e-2)

    print("KERNEL_OK")
</pallas_src>

<mosaic_0001>
module attributes {stable_mosaic.version = 11 : i64} {
  func.func @controller_kernel(%arg0: i32, %arg1: memref<24x10xf32, #tpu.memory_space<vmem>>, %arg2: memref<10x64xf32, #tpu.memory_space<vmem>>, %arg3: memref<1x64xf32, #tpu.memory_space<vmem>>, %arg4: memref<64x64xf32, #tpu.memory_space<vmem>>, %arg5: memref<1x64xf32, #tpu.memory_space<vmem>>, %arg6: memref<64x2xf32, #tpu.memory_space<vmem>>, %arg7: memref<1x2xf32, #tpu.memory_space<vmem>>, %arg8: memref<24x2xf32, #tpu.memory_space<vmem>>) attributes {dimension_semantics = [#tpu.dimension_semantics<parallel>], iteration_bounds = array<i64: 1>, scalar_prefetch = 0 : i64, scratch_operands = 0 : i64, tpu.core_type = #tpu.core_type<tc>, window_params = [{transform_indices = @transform_0, window_bounds = array<i64: 24, 10>}, {pipeline_mode = #tpu.pipeline_mode<synchronous>, transform_indices = @transform_1, window_bounds = array<i64: 10, 64>}, {pipeline_mode = #tpu.pipeline_mode<synchronous>, transform_indices = @transform_2, window_bounds = array<i64: 1, 64>}, {pipeline_mode = #tpu.pipeline_mode<synchronous>, transform_indices = @transform_3, window_bounds = array<i64: 64, 64>}, {pipeline_mode = #tpu.pipeline_mode<synchronous>, transform_indices = @transform_4, window_bounds = array<i64: 1, 64>}, {pipeline_mode = #tpu.pipeline_mode<synchronous>, transform_indices = @transform_5, window_bounds = array<i64: 64, 2>}, {pipeline_mode = #tpu.pipeline_mode<synchronous>, transform_indices = @transform_6, window_bounds = array<i64: 1, 2>}, {transform_indices = @transform_7, window_bounds = array<i64: 24, 2>}]} {
    %c0 = arith.constant 0 : index
    %c0_0 = arith.constant 0 : index
    %0 = vector.load %arg1[%c0, %c0_0] : memref<24x10xf32, #tpu.memory_space<vmem>>, vector<24x10xf32>
    %c0_1 = arith.constant 0 : index
    %c0_2 = arith.constant 0 : index
    %1 = vector.load %arg2[%c0_1, %c0_2] : memref<10x64xf32, #tpu.memory_space<vmem>>, vector<10x64xf32>
    %cst = arith.constant dense<0.000000e+00> : vector<24x64xf32>
    %2 = tpu.matmul %0, %1, %cst {dimension_numbers = #tpu.dot_dimension_numbers<[1], [0], [0], [1], [0, 0, 1, 1], [], []>} : vector<24x10xf32>, vector<10x64xf32>, vector<24x64xf32> -> vector<24x64xf32>
    %c0_3 = arith.constant 0 : index
    %c0_4 = arith.constant 0 : index
    %3 = vector.load %arg3[%c0_3, %c0_4] : memref<1x64xf32, #tpu.memory_space<vmem>>, vector<1x64xf32>
    %4 = vector.broadcast %3 : vector<1x64xf32> to vector<24x64xf32>
    %5 = arith.addf %2, %4 : vector<24x64xf32>
    %cst_5 = arith.constant 0.000000e+00 : f32
    %6 = vector.broadcast %cst_5 : f32 to vector<24x64xf32>
    %7 = arith.maximumf %5, %6 : vector<24x64xf32>
    %c0_6 = arith.constant 0 : index
    %c0_7 = arith.constant 0 : index
    %8 = vector.load %arg4[%c0_6, %c0_7] : memref<64x64xf32, #tpu.memory_space<vmem>>, vector<64x64xf32>
    %cst_8 = arith.constant dense<0.000000e+00> : vector<24x64xf32>
    %9 = tpu.matmul %7, %8, %cst_8 {dimension_numbers = #tpu.dot_dimension_numbers<[1], [0], [0], [1], [0, 0, 1, 1], [], []>} : vector<24x64xf32>, vector<64x64xf32>, vector<24x64xf32> -> vector<24x64xf32>
    %c0_9 = arith.constant 0 : index
    %c0_10 = arith.constant 0 : index
    %10 = vector.load %arg5[%c0_9, %c0_10] : memref<1x64xf32, #tpu.memory_space<vmem>>, vector<1x64xf32>
    %11 = vector.broadcast %10 : vector<1x64xf32> to vector<24x64xf32>
    %12 = arith.addf %9, %11 : vector<24x64xf32>
    %cst_11 = arith.constant 0.000000e+00 : f32
    %13 = vector.broadcast %cst_11 : f32 to vector<24x64xf32>
    %14 = arith.maximumf %12, %13 : vector<24x64xf32>
    %c0_12 = arith.constant 0 : index
    %c0_13 = arith.constant 0 : index
    %15 = vector.load %arg6[%c0_12, %c0_13] : memref<64x2xf32, #tpu.memory_space<vmem>>, vector<64x2xf32>
    %cst_14 = arith.constant dense<0.000000e+00> : vector<24x2xf32>
    %16 = tpu.matmul %14, %15, %cst_14 {dimension_numbers = #tpu.dot_dimension_numbers<[1], [0], [0], [1], [0, 0, 1, 1], [], []>} : vector<24x64xf32>, vector<64x2xf32>, vector<24x2xf32> -> vector<24x2xf32>
    %c0_15 = arith.constant 0 : index
    %c0_16 = arith.constant 0 : index
    %17 = vector.load %arg7[%c0_15, %c0_16] : memref<1x2xf32, #tpu.memory_space<vmem>>, vector<1x2xf32>
    %18 = vector.broadcast %17 : vector<1x2xf32> to vector<24x2xf32>
    %19 = arith.addf %16, %18 : vector<24x2xf32>
    %c0_17 = arith.constant 0 : index
    %c0_18 = arith.constant 0 : index
    %20 = vector.load %arg8[%c0_17, %c0_18] : memref<24x2xf32, #tpu.memory_space<vmem>>, vector<24x2xf32>
    tpu.vector_store %arg8[%c0_17, %c0_18], %19 {strides = array<i32>} : memref<24x2xf32, #tpu.memory_space<vmem>>, vector<24x2xf32>,
    return
  }
  func.func @transform_0(%arg0: i32) -> (i32, i32) {
    %c0_i32 = arith.constant 0 : i32
    %c0_i32_0 = arith.constant 0 : i32
    return %arg0, %c0_i32 : i32, i32
  }
  func.func @transform_1(%arg0: i32) -> (i32, i32) {
    %c0_i32 = arith.constant 0 : i32
    %c0_i32_0 = arith.constant 0 : i32
    %c0_i32_1 = arith.constant 0 : i32
    return %c0_i32, %c0_i32_0 : i32, i32
  }
  func.func @transform_2(%arg0: i32) -> (i32, i32) {
    %c0_i32 = arith.constant 0 : i32
    %c0_i32_0 = arith.constant 0 : i32
    %c0_i32_1 = arith.constant 0 : i32
    return %c0_i32, %c0_i32_0 : i32, i32
  }
  func.func @transform_3(%arg0: i32) -> (i32, i32) {
    %c0_i32 = arith.constant 0 : i32
    %c0_i32_0 = arith.constant 0 : i32
    %c0_i32_1 = arith.constant 0 : i32
    return %c0_i32, %c0_i32_0 : i32, i32
  }
  func.func @transform_4(%arg0: i32) -> (i32, i32) {
    %c0_i32 = arith.constant 0 : i32
    %c0_i32_0 = arith.constant 0 : i32
    %c0_i32_1 = arith.constant 0 : i32
    return %c0_i32, %c0_i32_0 : i32, i32
  }
  func.func @transform_5(%arg0: i32) -> (i32, i32) {
    %c0_i32 = arith.constant 0 : i32
    %c0_i32_0 = arith.constant 0 : i32
    %c0_i32_1 = arith.constant 0 : i32
    return %c0_i32, %c0_i32_0 : i32, i32
  }
  func.func @transform_6(%arg0: i32) -> (i32, i32) {
    %c0_i32 = arith.constant 0 : i32
    %c0_i32_0 = arith.constant 0 : i32
    %c0_i32_1 = arith.constant 0 : i32
    return %c0_i32, %c0_i32_0 : i32, i32
  }
  func.func @transform_7(%arg0: i32) -> (i32, i32) {
    %c0_i32 = arith.constant 0 : i32
    %c0_i32_0 = arith.constant 0 : i32
    return %arg0, %c0_i32 : i32, i32
  }
}

</mosaic_0001>

<bundles_post_ra>
// kernel: tpu_custom_call.1
= control target key start
LH: loop header
LB: loop body
LE: loop exit
PB: predicated region body
PF: predicated region fallthrough
CT: control target
= control target key end

     0   :  { %vm48_vm0 = vcmask 1041408   ;;  %v460_v0 = vmov 0.0   ;;  %vm461_vm1 = vmmov 0   ;;  %vm38_vm2 = vcmask 80896   ;;  %s628_s1 = inlined_call_operand.vmem [shape: f32[10,64], index: 1, kind: input, shape index: {}]   ;;  %s629_s0 = inlined_call_operand.vmem [shape: f32[24,10], index: 0, kind: input, shape index: {}]   ;;  %s630_s3 = inlined_call_operand.vmem [shape: f32[64,64], index: 3, kind: input, shape index: {}]   ;;  %s631_s5 = inlined_call_operand.vmem [shape: f32[64,2], index: 5, kind: input, shape index: {}]   ;;  %s632_s2 = inlined_call_operand.vmem [shape: f32[1,64], index: 2, kind: input, shape index: {}]   ;;  %s633_s4 = inlined_call_operand.vmem [shape: f32[1,64], index: 4, kind: input, shape index: {}]   ;;  %s634_s6 = inlined_call_operand.vmem [shape: f32[1,2], index: 6, kind: input, shape index: {}]   ;;  %s635_s7 = inlined_call_operand.vmem [shape: f32[24,2], index: 7, kind: output, shape index: {}]  }
   0x1   :  { %395 = vmatprep.subr.mxu0 %v460_v0  ;;  %v30_v1 = vld [vmem:[%s628_s1 + $0x8] sm:$0x3]  ;;  %v29_v2 = vld [vmem:[%s628_s1] sm:$0xff]  ;;  %399 = vmatprep.mubr.msk.f32.mxu0 %vm461_vm1, %v460_v0  ;;  %v142_v4 = vld [vmem:[%s630_s3 + $0x38] sm:$0xff]  ;;  %vm150_vm3 = vcmask 523264   ;;  %vm347_vm4 = vcmask 15360  }
   0x2   :  { %396 = vmatpush3.msk.msra.mxu0 %vm48_vm0, %v30_v1  ;;  %v26_v3 = vld [vmem:[%s629_s0] sm:$0xff]  ;;  %408 = vmatprep.subr.mxu1 %v460_v0  ;;  %v141_v5 = vld [vmem:[%s630_s3 + $0x30] sm:$0xff]  ;;  %v140_v6 = vld [vmem:[%s630_s3 + $0x28] sm:$0xff] }
   0x3   :  { %397 = vmatprep.subr.mxu0 %v460_v0  ;;  %409 = vmatpush3.msra.mxu1 %v142_v4  ;;  %v27_v7 = vld [vmem:[%s629_s0 + $0x8] sm:$0xff]  ;;  %v139_v8 = vld [vmem:[%s630_s3 + $0x20] sm:$0xff]  ;;  %v138_v9 = vld [vmem:[%s630_s3 + $0x18] sm:$0xff] }
   0x4   :  { %398 = vmatpush3.msra.mxu0 %v29_v2  ;;  %410 = vmatprep.subr.mxu1 %v460_v0  ;;  %v28_v10 = vld [vmem:[%s629_s0 + $0x10] sm:$0xff]  ;;  %v136_v12 = vld [vmem:[%s630_s3 + $0x8] sm:$0xff]  ;;  %v135_v13 = vld [vmem:[%s630_s3] sm:$0xff] }
   0x5   :  { %400 = vmatmul.mubr.msk.f32.vlgmr.msra.gmra.mxu0 %vm38_vm2, %v26_v3  ;;  %411 = vmatpush3.msra.mxu1 %v141_v5  ;;  %v137_v11 = vld [vmem:[%s630_s3 + $0x10] sm:$0xff]  ;;  %v250_v14 = vld [vmem:[%s631_s5 + $0x38] sm:$0xff]  ;;  %v248_v16 = vld [vmem:[%s631_s5 + $0x28] sm:$0xff] }
   0x6   :  { %402 = vmatprep.mubr.msk.f32.mxu0 %vm461_vm1, %v460_v0  ;;  %412 = vmatprep.subr.mxu1 %v460_v0  ;;  %v249_v15 = vld [vmem:[%s631_s5 + $0x30] sm:$0xff]  ;;  %v247_v17 = vld [vmem:[%s631_s5 + $0x20] sm:$0xff]  ;;  %v246_v18 = vld [vmem:[%s631_s5 + $0x18] sm:$0xff] }
   0x7   :  { %413 = vmatpush3.msra.mxu1 %v140_v6  ;;  %424 = vmatprep.mubr.msk.f32.mxu1 %vm461_vm1, %v460_v0  ;;  %v355_v19 = vld [vmem:[%s632_s2] ss:$0 sm:$0xff]  ;;  %v245_v32 = vld [vmem:[%s631_s5 + $0x10] sm:$0xff]  ;;  %v244_v33 = vld [vmem:[%s631_s5 + $0x8] sm:$0xff] }
   0x8   :  { %414 = vmatprep.subr.mxu1 %v460_v0  ;;  %433 = vmatprep.subr.mxu0 %v460_v0  ;;  %v243_v34 = vld [vmem:[%s631_s5] sm:$0xff] }
   0x9   :  { %403 = vmatmul.mubr.msk.f32.gmra.mxu0 %vm38_vm2, %v27_v7  ;;  %415 = vmatpush3.msra.mxu1 %v139_v8  ;;  %v360_v35 = vld [vmem:[%s633_s4] ss:$0 sm:$0xff] }
   0xa   :  { %405 = vmatprep.mubr.msk.f32.mxu0 %vm461_vm1, %v460_v0  ;;  %416 = vmatprep.subr.mxu1 %v460_v0  ;;  %v364_v48 = vld [vmem:[%s634_s6] ss:$0 sm:$0xff] }
   0xb   :  { %417 = vmatpush3.msra.mxu1 %v138_v9  ;;  %434 = vmatpush3.msra.mxu0 %v250_v14 }
   0xc   :  { %418 = vmatprep.subr.mxu1 %v460_v0  ;;  %435 = vmatprep.subr.mxu0 %v460_v0 }
   0xd   :  { %406 = vmatmul.mubr.msk.f32.gmra.mxu0 %vm38_vm2, %v28_v10  ;;  %419 = vmatpush3.msra.mxu1 %v137_v11 }
   0xe   :  { %449 = vmatprep.mubr.msk.f32.mxu0 %vm461_vm1, %v460_v0  ;;  %420 = vmatprep.subr.mxu1 %v460_v0 }
   0xf   :  { %421 = vmatpush3.msra.mxu1 %v136_v12  ;;  %436 = vmatpush3.msra.mxu0 %v249_v15 }
  0x10   :  { %422 = vmatprep.subr.mxu1 %v460_v0  ;;  %437 = vmatprep.subr.mxu0 %v460_v0 }
  0x11   :  { %423 = vmatpush3.msra.mxu1 %v135_v13  ;;  %438 = vmatpush3.msra.mxu0 %v248_v16 }
  0x12   :  { %439 = vmatprep.subr.mxu0 %v460_v0 }
  0x13   :  { %440 = vmatpush3.msra.mxu0 %v247_v17 }
  0x14   :  { %441 = vmatprep.subr.mxu0 %v460_v0 }
  0x15   :  { %442 = vmatpush3.msra.mxu0 %v246_v18 }
  0x16   :  { %443 = vmatprep.subr.mxu0 %v460_v0 }
  0x17   :  { %444 = vmatpush3.msra.mxu0 %v245_v32 }
  0x18   :  { %445 = vmatprep.subr.mxu0 %v460_v0 }
  0x19   :  { %446 = vmatpush3.msra.mxu0 %v244_v33 }
  0x1a   :  { %447 = vmatprep.subr.mxu0 %v460_v0 }
  0x1b   :  { %448 = vmatpush3.msra.mxu0 %v243_v34 }
  0xc5   :  { %v118_v20 = vpop.f32.mrf.mxu0 }
  0xc6   :  { %v119_v21 = vadd.f32 %v355_v19, %v118_v20 }
  0xc7   :  { %v401_v22 = vpop.f32.mrf.mxu0 }
  0xc8   :  { %v132_v23 = vmax.f32 %v119_v21, 0.0 }
  0xc9   :  { %v123_v24 = vpop.f32.mrf.mxu0 }
  0xca   :  { %v124_v25 = vadd.f32 %v355_v19, %v123_v24  ;;  %425 = vmatmul.mubr.msk.f32.vlgmr.msra.gmra.mxu1 %vm150_vm3, %v132_v23 }
  0xcb   :  { %v404_v26 = vpop.f32.mrf.mxu0  ;;  %427 = vmatprep.mubr.msk.f32.mxu1 %vm461_vm1, %v460_v0 }
  0xcc   :  { %v133_v27 = vmax.f32 %v124_v25, 0.0 }
  0xcd   :  { %v128_v28 = vpop.f32.mrf.mxu0 }
  0xce   :  { %v129_v29 = vadd.f32 %v355_v19, %v128_v28  ;;  %428 = vmatmul.mubr.msk.f32.gmra.mxu1 %vm150_vm3, %v133_v27 }
  0xcf   :  { %v407_v30 = vpop.f32.mrf.mxu0  ;;  %430 = vmatprep.mubr.msk.f32.mxu1 %vm461_vm1, %v460_v0 }
  0xd0   :  { %v134_v31 = vmax.f32 %v129_v29, 0.0 }
  0xd2   :  { %431 = vmatmul.mubr.msk.f32.gmra.mxu1 %vm150_vm3, %v134_v31 }
 0x18a   :  { %v226_v36 = vpop.f32.mrf.mxu1 }
 0x18b   :  { %v227_v37 = vadd.f32 %v360_v35, %v226_v36 }
 0x18c   :  { %v426_v38 = vpop.f32.mrf.mxu1 }
 0x18d   :  { %v240_v39 = vmax.f32 %v227_v37, 0.0 }
 0x18e   :  { %v231_v40 = vpop.f32.mrf.mxu1 }
 0x18f   :  { %v232_v41 = vadd.f32 %v360_v35, %v231_v40  ;;  %450 = vmatmul.mubr.msk.f32.vlgmr.msra.gmra.mxu0 %vm150_vm3, %v240_v39 }
 0x190   :  { %v429_v42 = vpop.f32.mrf.mxu1  ;;  %452 = vmatprep.mubr.msk.f32.mxu0 %vm461_vm1, %v460_v0 }
 0x191   :  { %v241_v43 = vmax.f32 %v232_v41, 0.0 }
 0x192   :  { %v236_v44 = vpop.f32.mrf.mxu1 }
 0x193   :  { %v237_v45 = vadd.f32 %v360_v35, %v236_v44  ;;  %453 = vmatmul.mubr.msk.f32.gmra.mxu0 %vm150_vm3, %v241_v43 }
 0x194   :  { %v432_v46 = vpop.f32.mrf.mxu1  ;;  %455 = vmatprep.mubr.msk.f32.mxu0 %vm461_vm1, %v460_v0 }
 0x195   :  { %v242_v47 = vmax.f32 %v237_v45, 0.0 }
 0x197   :  { %456 = vmatmul.mubr.msk.f32.gmra.mxu0 %vm150_vm3, %v242_v47 }
 0x24f   :  { %v333_v49 = vpop.f32.mrf.mxu0 }
 0x250   :  { %v334_v50 = vadd.f32 %v364_v48, %v333_v49 }
 0x251   :  { %v451_v51 = vpop.f32.mrf.mxu0 }
 0x252   :  { %348 = vst.msk [vmem:[%s635_s7] sm:$0xff] %vm347_vm4, %v334_v50 }
 0x253   :  { %v338_v52 = vpop.f32.mrf.mxu0 }
 0x254   :  { %v339_v53 = vadd.f32 %v364_v48, %v338_v52 }
 0x255   :  { %v454_v54 = vpop.f32.mrf.mxu0 }
 0x256   :  { %349 = vst.msk [vmem:[%s635_s7 + $0x8] sm:$0xff] %vm347_vm4, %v339_v53 }
 0x257   :  { %v343_v55 = vpop.f32.mrf.mxu0 }
 0x258   :  { %v344_v56 = vadd.f32 %v364_v48, %v343_v55 }
 0x259   :  { %v457_v57 = vpop.f32.mrf.mxu0 }
 0x25a   :  { %350 = vst.msk [vmem:[%s635_s7 + $0x10] sm:$0xff] %vm347_vm4, %v344_v56 }

</bundles_post_ra>
